<compile_context>
chip_gen: v6e
topology: v6e:2x2x1
jax: 0.10.0
libtpu: 0.0.40
codegen_flags: <defaults>
</compile_context>

<pallas_src>
import jax
import jax.numpy as jnp
from jax import lax
from jax.experimental import pallas as pl
from jax.experimental.pallas import tpu as pltpu


def _round_up(n: int, m: int) -> int:
    return ((n + m - 1) // m) * m


def _pick_time_chunk(T: int, max_chunk: int) -> int:
    for tc in range(min(T, max_chunk), 0, -1):
        if T % tc == 0:
            return tc
    return 1


# ---------------- projection kernel: large-M matmul + bias ------------------

def proj_kernel(x_ref, w_ref, b_ref, o_ref):
    o_ref[...] = (b_ref[...]
                  + jnp.dot(x_ref[...], w_ref[...],
                            preferred_element_type=jnp.float32)
                  ).astype(o_ref.dtype)


def _proj(x2d, w, b, out_dtype):
    """out = x2d @ w + b, tiled over rows.  x2d:(M,K) w:(K,N) b:(1,N)."""
    M, K = x2d.shape
    N = w.shape[1]
    tm = M
    for cand in (1024, 512, 256, 128, 64, 32, 16, 8):
        if M % cand == 0:
            tm = cand
            break
    return pl.pallas_call(
        proj_kernel,
        out_shape=jax.ShapeDtypeStruct((M, N), out_dtype),
        grid_spec=pltpu.PrefetchScalarGridSpec(
            num_scalar_prefetch=0,
            grid=(M // tm,),
            in_specs=[
                pl.BlockSpec((tm, K), lambda i: (i, 0)),
                pl.BlockSpec((K, N), lambda i: (0, 0)),
                pl.BlockSpec((1, N), lambda i: (0, 0)),
            ],
            out_specs=pl.BlockSpec((tm, N), lambda i: (i, 0)),
        ),
        compiler_params=pltpu.CompilerParams(
            dimension_semantics=("parallel",)),
    )(x2d, w, b)


# ---------------- recurrent kernel: h' = sigmoid(xproj_t + h @ W1h^T) -------

def rnn_rec_kernel(xproj_ref, h0_ref, w1h_ref, hseq_ref, hfin_ref):
    c = pl.program_id(1)   # time-chunk index ("arbitrary" / sequential)

    # The final-hidden output block doubles as the VMEM-resident carry.
    @pl.when(c == 0)
    def _():
        hfin_ref[...] = h0_ref[...]

    w1h = w1h_ref[...]                     # (Hp, Hp) bf16, VMEM-resident
    n_steps = hseq_ref.shape[0]            # Tc (static)

    def step(i, h):
        pre = xproj_ref[i] + jnp.dot(h.astype(jnp.bfloat16), w1h,
                                     preferred_element_type=jnp.float32)
        hidden = jax.nn.sigmoid(pre)       # (block_b, Hp) f32
        hseq_ref[i] = hidden.astype(hseq_ref.dtype)
        return hidden

    hfin_ref[...] = lax.fori_loop(0, n_steps, step, hfin_ref[...], unroll=True)


def rnn_forward_seq(xs, h0, w1, b1, w2, b2, *, block_b=None, time_chunk=8):
    """Run the RNN cell over a whole sequence.

    xs: (T, B, In)   h0: (B, H)
    w1: (H, In+H), b1: (H,), w2: (O, H), b2: (O,)  (PyTorch nn.Linear layout).
    Returns (outputs (T, B, O), final hidden (B, H)).
    """
    T, B, In = xs.shape
    H = w1.shape[0]
    O = w2.shape[0]
    assert w1.shape[1] == In + H and w2.shape[1] == H

    f32, bf16 = jnp.float32, jnp.bfloat16

    # Lane-dense padded sizes.
    Hp = _round_up(H, 128)
    Op = _round_up(O, 128)
    Bp = _round_up(B, 8)
    if block_b is None:
        block_b = min(Bp, 128)             # larger MXU M dim per step
    Bp = _round_up(Bp, block_b)
    nb = Bp // block_b
    Tc = _pick_time_chunk(T, time_chunk)
    n_chunks = T // Tc

    # Split in2hidden into x/h halves, transpose to (in, out) layout, zero-pad
    # to lane-dense shapes, and narrow matmul operands to bf16.  Padding is
    # exact: padded weight rows/cols and biases are zero.
    w1x_t = jnp.zeros((In, Hp), bf16).at[:, :H].set(w1[:, :In].T.astype(bf16))
    w1h_t = jnp.zeros((Hp, Hp), bf16).at[:H, :H].set(w1[:, In:].T.astype(bf16))
    b1p = jnp.zeros((1, Hp), f32).at[:, :H].set(b1.astype(f32))
    w2t = jnp.zeros((Hp, Op), bf16).at[:H, :O].set(w2.T.astype(bf16))
    b2p = jnp.zeros((1, Op), f32).at[:, :O].set(b2.astype(f32))

    xs_p = jnp.zeros((T, Bp, In), bf16).at[:, :B, :].set(xs.astype(bf16))
    h0_p = jnp.zeros((Bp, Hp), f32).at[:B, :H].set(h0.astype(f32))

    # (1) Hoisted input projection: one big MXU matmul for all timesteps.
    xproj = _proj(xs_p.reshape(T * Bp, In), w1x_t, b1p, f32)
    xproj = xproj.reshape(T, Bp, Hp)

    const = lambda b, c: (0, 0)

    # (2) Serial recurrence only: grid = (batch blocks, time chunks).
    hseq, hfin = pl.pallas_call(
        rnn_rec_kernel,
        out_shape=(
            jax.ShapeDtypeStruct((T, Bp, Hp), bf16),   # hidden for every step
            jax.ShapeDtypeStruct((Bp, Hp), f32),       # final hidden / carry
        ),
        grid_spec=pltpu.PrefetchScalarGridSpec(
            num_scalar_prefetch=0,
            grid=(nb, n_chunks),
            in_specs=[
                pl.BlockSpec((Tc, block_b, Hp), lambda b, c: (c, b, 0)),  # xproj chunk
                pl.BlockSpec((block_b, Hp), lambda b, c: (b, 0)),         # h0
                pl.BlockSpec((Hp, Hp), const),                            # W1h^T
            ],
            out_specs=(
                pl.BlockSpec((Tc, block_b, Hp), lambda b, c: (c, b, 0)),  # hidden_t
                pl.BlockSpec((block_b, Hp), lambda b, c: (b, 0)),         # h_T
            ),
        ),
        # Reuse the padded h0 HBM buffer for the final-hidden output.
        input_output_aliases={1: 1},
        compiler_params=pltpu.CompilerParams(
            dimension_semantics=("parallel", "arbitrary")),
    )(xproj, h0_p, w1h_t)

    # (3) Deferred output projection: one big MXU matmul for all timesteps.
    out = _proj(hseq.reshape(T * Bp, Hp), w2t, b2p, f32)
    out = out.reshape(T, Bp, Op)

    return out[:, :B, :O], hfin[:B, :H]


def rnn_forward(x, hidden_state, w1, b1, w2, b2):
    """Single-step forward matching the PyTorch module: (output, hidden)."""
    out_seq, hidden = rnn_forward_seq(x[None], hidden_state, w1, b1, w2, b2)
    return out_seq[0], hidden


def init_params(key, input_size, hidden_size, output_size):
    """Deterministic init mimicking nn.Linear's kaiming-uniform bounds."""
    k1, k2, k3, k4 = jax.random.split(key, 4)
    fan_in1 = input_size + hidden_size
    bound1 = 1.0 / jnp.sqrt(fan_in1)
    w1 = jax.random.uniform(k1, (hidden_size, fan_in1),
                            minval=-bound1, maxval=bound1, dtype=jnp.float32)
    b1 = jax.random.uniform(k2, (hidden_size,),
                            minval=-bound1, maxval=bound1, dtype=jnp.float32)
    fan_in2 = hidden_size
    bound2 = 1.0 / jnp.sqrt(fan_in2)
    w2 = jax.random.uniform(k3, (output_size, fan_in2),
                            minval=-bound2, maxval=bound2, dtype=jnp.float32)
    b2 = jax.random.uniform(k4, (output_size,),
                            minval=-bound2, maxval=bound2, dtype=jnp.float32)
    return w1, b1, w2, b2


if __name__ == "__main__":
    input_size, hidden_size, output_size = 16, 32, 8
    batch, seq_len = 2, 8

    key = jax.random.PRNGKey(0)
    kx, kh, kp = jax.random.split(key, 3)

    xs = jax.random.normal(kx, (seq_len, batch, input_size), dtype=jnp.float32)
    h0 = jax.random.normal(kh, (batch, hidden_size), dtype=jnp.float32)
    w1, b1, w2, b2 = init_params(kp, input_size, hidden_size, output_size)

    # Pure-JAX f32 reference (same semantics as the PyTorch forward, stepped).
    def ref_step(h, x):
        combined = jnp.concatenate([x, h], axis=1)
        h_new = jax.nn.sigmoid(combined @ w1.T + b1)
        return h_new, h_new @ w2.T + b2

    h_ref = h0
    outs_ref = []
    for t in range(seq_len):
        h_ref, o = ref_step(h_ref, xs[t])
        outs_ref.append(o)
    outs_ref = jnp.stack(outs_ref)

    # Pallas kernels: hoisted input proj -> chunked recurrence -> deferred
    # output proj.
    outs, h_final = rnn_forward_seq(xs, h0, w1, b1, w2, b2)
    jax.block_until_ready((outs, h_final))

    assert outs.shape == (seq_len, batch, output_size)
    assert h_final.shape == (batch, hidden_size)
    # Tolerances loosened vs f32 reference because matmul operands are bf16.
    assert jnp.allclose(outs, outs_ref, atol=2e-2, rtol=2e-2)
    assert jnp.allclose(h_final, h_ref, atol=2e-2, rtol=2e-2)

    # Single-step API (exactly the module's forward signature).
    out1, hid1 = rnn_forward(xs[0], h0, w1, b1, w2, b2)
    jax.block_until_ready((out1, hid1))
    hid1_ref = jax.nn.sigmoid(jnp.concatenate([xs[0], h0], axis=1) @ w1.T + b1)
    assert jnp.allclose(out1, outs_ref[0], atol=2e-2, rtol=2e-2)
    assert jnp.allclose(hid1, hid1_ref, atol=2e-2, rtol=2e-2)

    print("KERNEL_OK")
</pallas_src>

<mosaic_0001>
module attributes {stable_mosaic.version = 11 : i64} {
  func.func @proj_kernel(%arg0: i32, %arg1: memref<64x16xbf16, #tpu.memory_space<vmem>>, %arg2: memref<16x128xbf16, #tpu.memory_space<vmem>>, %arg3: memref<1x128xf32, #tpu.memory_space<vmem>>, %arg4: memref<64x128xf32, #tpu.memory_space<vmem>>) attributes {dimension_semantics = [#tpu.dimension_semantics<parallel>], iteration_bounds = array<i64: 1>, scalar_prefetch = 0 : i64, scratch_operands = 0 : i64, tpu.core_type = #tpu.core_type<tc>, window_params = [{transform_indices = @transform_0, window_bounds = array<i64: 64, 16>}, {pipeline_mode = #tpu.pipeline_mode<synchronous>, transform_indices = @transform_1, window_bounds = array<i64: 16, 128>}, {pipeline_mode = #tpu.pipeline_mode<synchronous>, transform_indices = @transform_2, window_bounds = array<i64: 1, 128>}, {transform_indices = @transform_3, window_bounds = array<i64: 64, 128>}]} {
    %c0 = arith.constant 0 : index
    %c0_0 = arith.constant 0 : index
    %0 = vector.load %arg3[%c0, %c0_0] : memref<1x128xf32, #tpu.memory_space<vmem>>, vector<1x128xf32>
    %c0_1 = arith.constant 0 : index
    %c0_2 = arith.constant 0 : index
    %1 = vector.load %arg1[%c0_1, %c0_2] : memref<64x16xbf16, #tpu.memory_space<vmem>>, vector<64x16xbf16>
    %c0_3 = arith.constant 0 : index
    %c0_4 = arith.constant 0 : index
    %2 = vector.load %arg2[%c0_3, %c0_4] : memref<16x128xbf16, #tpu.memory_space<vmem>>, vector<16x128xbf16>
    %cst = arith.constant dense<0.000000e+00> : vector<64x128xf32>
    %3 = tpu.matmul %1, %2, %cst {dimension_numbers = #tpu.dot_dimension_numbers<[1], [0], [0], [1], [0, 0, 1, 1], [], []>} : vector<64x16xbf16>, vector<16x128xbf16>, vector<64x128xf32> -> vector<64x128xf32>
    %4 = vector.broadcast %0 : vector<1x128xf32> to vector<64x128xf32>
    %5 = arith.addf %4, %3 : vector<64x128xf32>
    %c0_5 = arith.constant 0 : index
    %c0_6 = arith.constant 0 : index
    %6 = vector.load %arg4[%c0_5, %c0_6] : memref<64x128xf32, #tpu.memory_space<vmem>>, vector<64x128xf32>
    tpu.vector_store %arg4[%c0_5, %c0_6], %5 {strides = array<i32>} : memref<64x128xf32, #tpu.memory_space<vmem>>, vector<64x128xf32>,
    return
  }
  func.func @transform_0(%arg0: i32) -> (i32, i32) {
    %c0_i32 = arith.constant 0 : i32
    %c0_i32_0 = arith.constant 0 : i32
    return %arg0, %c0_i32 : i32, i32
  }
  func.func @transform_1(%arg0: i32) -> (i32, i32) {
    %c0_i32 = arith.constant 0 : i32
    %c0_i32_0 = arith.constant 0 : i32
    %c0_i32_1 = arith.constant 0 : i32
    return %c0_i32, %c0_i32_0 : i32, i32
  }
  func.func @transform_2(%arg0: i32) -> (i32, i32) {
    %c0_i32 = arith.constant 0 : i32
    %c0_i32_0 = arith.constant 0 : i32
    %c0_i32_1 = arith.constant 0 : i32
    return %c0_i32, %c0_i32_0 : i32, i32
  }
  func.func @transform_3(%arg0: i32) -> (i32, i32) {
    %c0_i32 = arith.constant 0 : i32
    %c0_i32_0 = arith.constant 0 : i32
    return %arg0, %c0_i32 : i32, i32
  }
}

</mosaic_0001>

<bundles_post_ra>
// kernel: tpu_custom_call.1
= control target key start
LH: loop header
LB: loop body
LE: loop exit
PB: predicated region body
PF: predicated region fallthrough
CT: control target
= control target key end

     0   :  { %vm53_vm0 = vcmask 130048   ;;  %s270_s0 = inlined_call_operand.vmem [shape: bf16[64,16], index: 0, kind: input, shape index: {}]   ;;  %s271_s1 = inlined_call_operand.vmem [shape: bf16[16,128], index: 1, kind: input, shape index: {}]   ;;  %s272_s2 = inlined_call_operand.vmem [shape: f32[1,128], index: 2, kind: input, shape index: {}]   ;;  %s273_s3 = inlined_call_operand.hbm [shape: f32[64,128], index: 3, kind: output, shape index: {}]  }
   0x1   :  { %v199_v0 = vld [vmem:[%s271_s1] sm:$0xff]   ;;  %v201_v2 = vld [vmem:[%s270_s0 + $0x10] sm:$0xff]   ;;  %v202_v3 = vld [vmem:[%s270_s0 + $0x8] sm:$0xff]  }
   0x2   :  { %v200_v1 = vld [vmem:[%s270_s0] sm:$0xff]   ;;  %184 = vmatprep.subr.bf16.mxu0 %v199_v0  ;;  %194 = vmatprep.subr.bf16.mxu1 %v199_v0  ;;  %v203_v4 = vld [vmem:[%s270_s0 + $0x18] sm:$0xff]  }
   0x3   :  { %185 = vmatpush3.bf16.msra.mxu0 %v199_v0  ;;  %195 = vmatpush3.bf16.msra.mxu1 %v199_v0 }
   0x4   :  { %186 = vmatprep.mubr.msk.bf16.mxu0 %vm53_vm0, %v200_v1  ;;  %190 = vmatprep.mubr.msk.bf16.mxu1 %vm53_vm0, %v201_v2 }
   0x5   :  { %8 = vsyncpa [#allocation3], 0  ;;  %v178_v5 = vld [vmem:[%s272_s2] ss:$0 sm:$0xff]  ;;  %s226_s23 = smov [#allocation2]  }
   0x6   :  { %187 = vmatmul.mubr.msk.bf16.vlgmr.msra.gmra.mxu0 %vm53_vm0, %v202_v3  ;;  %191 = vmatmul.mubr.msk.bf16.vlgmr.msra.gmra.mxu1 %vm53_vm0, %v203_v4  ;;  %s158_s24 = sshll.u32 %s226_s23, 4  ;;  %s159_s24 = int_to_ptr.vmem [resolvable:$true] %s158_s24 }
   0x7   :  { %s204_s0 = scalar_lea.vmem %s159_s24, 1024  ;;  %p209_p1 = scmp.lt.s32.totalorder %s159_s24, %s159_s24 }
   0x8   :  { %p205_p0 = scmp.ne.s32.totalorder %s159_s24, %s204_s0  ;;  %p210_p2 = scmp.lt.s32.totalorder %s204_s0, %s204_s0 }
   0xa   :  { %p211_p3 = por %p210_p2, %p209_p1 }
   0xc   :  { %p212_p4 = pnand %p211_p3, %p205_p0 }
  0xc6   :  { %v188_v6 = vpop.f32.mrf.mxu0  ;;  %v192_v7 = vpop.f32.mrf.mxu1 }
  0xc7   :  { %v139_v8 = vadd.f32 %v188_v6, %v178_v5  ;;  %v143_v9 = vadd.f32 %v192_v7, %v178_v5 }
  0xc8   :  { %v100_v10 = vpop.f32.mrf.mxu0  ;;  %v116_v11 = vpop.f32.mrf.mxu1 }
  0xc9   :  { %147 = vst [vmem:[#allocation2 + $0x10] sm:$0xff] %v139_v8  ;;  %151 = vst [vmem:[#allocation2 + $0x30] sm:$0xff] %v143_v9  ;;  %v137_v12 = vadd.f32 %v178_v5, %v100_v10  ;;  %v141_v13 = vadd.f32 %v178_v5, %v116_v11 }
  0xca   :  { %v189_v14 = vpop.f32.mrf.mxu0  ;;  %v193_v15 = vpop.f32.mrf.mxu1 }
  0xcb   :  { %145 = vst [vmem:[#allocation2] sm:$0xff] %v137_v12  ;;  %149 = vst [vmem:[#allocation2 + $0x20] sm:$0xff] %v141_v13  ;;  %v140_v16 = vadd.f32 %v189_v14, %v178_v5  ;;  %v144_v17 = vadd.f32 %v193_v15, %v178_v5 }
  0xcc   :  { %v103_v18 = vpop.f32.mrf.mxu0  ;;  %v119_v19 = vpop.f32.mrf.mxu1 }
  0xcd   :  { %148 = vst [vmem:[#allocation2 + $0x18] sm:$0xff] %v140_v16  ;;  %152 = vst [vmem:[#allocation2 + $0x38] sm:$0xff] %v144_v17  ;;  %v138_v20 = vadd.f32 %v178_v5, %v103_v18  ;;  %v142_v21 = vadd.f32 %v178_v5, %v119_v19 }
  0xcf   :  { %146 = vst [vmem:[#allocation2 + $0x8] sm:$0xff] %v138_v20  ;;  %150 = vst [vmem:[#allocation2 + $0x28] sm:$0xff] %v142_v21 }
  0xd0   :  { %215 = shalt.err (!%p212_p4)
}
  0xd1   :  { %s227_s2 = smov 128   ;;  %s228_s25 = smov 8  }
  0xd2   :  { %164 = dma.vmem_to_hbm [thread:$0]  %s159_s24, 1024, %s273_s3, [#allocation3], %s227_s2, %s227_s2, %s228_s25  }
  0xd3   :  { %224 = dma.done.wait [#allocation3], 1024  }
  0xd4   :  { %225 = vsyncadd [#allocation3], 4294966272 }
  0xd5   :  { %168 = vsyncpa [#allocation3], 1 }

</bundles_post_ra>
